<compile_context>
chip_gen: v6e
topology: v6e:2x2x1
jax: 0.10.0
libtpu: 0.0.40
codegen_flags: <defaults>
</compile_context>

<pallas_src>
import jax
import jax.numpy as jnp
from jax.experimental import pallas as pl
from jax.experimental.pallas import tpu as pltpu


def _round_up(x: int, m: int) -> int:
    return ((x + m - 1) // m) * m


def graph_generator_kernel(xm_ref, w1_ref, b1_ref, w2_ref, b2_ref, g_ref, out_ref):
    """Fused MLP + grouped softmax on one batch tile.

    xm_ref : (bt, CV)   bf16   mean-pooled inputs
    w1_ref : (CV, H)    bf16
    b1_ref : (1, H)     f32
    w2_ref : (H, VVp)   bf16   (columns zero-padded to a multiple of 128)
    b2_ref : (1, VVp)   f32
    g_ref  : (VVp, VVp) f32    block-diagonal group-sum matrix
    out_ref: (bt, VVp)  f32    grouped-softmax probabilities (lane-dense)
    """
    # Linear(CV -> H) + ReLU : bf16 operands, f32 MXU accumulation.
    h = jnp.dot(xm_ref[...], w1_ref[...], preferred_element_type=jnp.float32)
    h = jnp.maximum(h + b1_ref[...], 0.0)                       # (bt, H) f32

    # Linear(H -> VVp): one lane-dense MXU pass for the whole logits slab.
    logits = jnp.dot(h.astype(jnp.bfloat16), w2_ref[...],
                     preferred_element_type=jnp.float32)
    logits = logits + b2_ref[...]                               # (bt, VVp) f32

    # Grouped softmax over each contiguous group of V lanes, kept entirely in
    # the lane-dense (bt, VVp) layout (no (bt, V, V) relayout):
    #   * the row-global max is shift-invariant within every group,
    #   * per-group sums, broadcast back to each lane of the group, come from
    #     one (bt, VVp) x (VVp, VVp) matmul against the constant
    #     block-diagonal group matrix G (padded lanes live in their own
    #     groups, so they never pollute real groups).
    m = jnp.max(logits, axis=-1, keepdims=True)                 # (bt, 1)
    e = jnp.exp(logits - m)                                     # (bt, VVp)
    denom = jnp.dot(e, g_ref[...], preferred_element_type=jnp.float32)
    denom = jnp.maximum(denom, jnp.finfo(jnp.float32).tiny)     # guard: all-underflow group
    # Exact divide: adjacency rows sum to 1 within f32 precision.
    out_ref[...] = (e / denom).astype(out_ref.dtype)


def graph_generator_forward(x, w1, b1, w2, b2, *, b_tile=512):
    task_num, N, C, T, V, M = x.shape
    B = task_num * N
    CV = C * V
    H = w1.shape[1]
    VV = V * V
    VVp = _round_up(VV, 128)          # lane-dense (unmasked) output stores

    # (T, M) mean stays in XLA over x's native layout (the one unavoidable
    # full pass over x); stream the pooled activations as bf16.
    xm = jnp.mean(x, axis=(3, 5), dtype=jnp.float32)            # (task, N, C, V)
    xm = xm.reshape(B, CV).astype(jnp.bfloat16)                 # C-major merge, as PyTorch

    # Zero-pad output-facing weight/bias columns to VVp; padded logits are 0
    # and land in their own softmax groups, sliced off after the call.
    w2p = jnp.zeros((H, VVp), jnp.bfloat16).at[:, :VV].set(w2.astype(jnp.bfloat16))
    b2p = jnp.zeros((1, VVp), jnp.float32).at[:, :VV].set(b2.reshape(1, VV).astype(jnp.float32))

    # Block-diagonal group-sum matrix: G[i, j] = 1 iff i//V == j//V.
    idx = jnp.arange(VVp)
    G = (idx[:, None] // V == idx[None, :] // V).astype(jnp.float32)

    # Batch tile: multiple of 16 (bf16 sublane packing), >=2 grid steps when B
    # allows (so both v7x TensorCores get work), capped at the bandwidth knee.
    bt = max(16, min(b_tile, _round_up(pl.cdiv(B, 2), 16)))
    grid = (pl.cdiv(B, bt),)

    a_flat = pl.pallas_call(
        graph_generator_kernel,
        out_shape=jax.ShapeDtypeStruct((B, VVp), jnp.float32),
        grid_spec=pltpu.PrefetchScalarGridSpec(
            num_scalar_prefetch=0,
            grid=grid,
            in_specs=[
                pl.BlockSpec((bt, CV), lambda i: (i, 0)),       # batch-tiled activations
                pl.BlockSpec((CV, H), lambda i: (0, 0)),        # resident weights
                pl.BlockSpec((1, H), lambda i: (0, 0)),
                pl.BlockSpec((H, VVp), lambda i: (0, 0)),
                pl.BlockSpec((1, VVp), lambda i: (0, 0)),
                pl.BlockSpec((VVp, VVp), lambda i: (0, 0)),     # group-sum matrix
            ],
            out_specs=pl.BlockSpec((bt, VVp), lambda i: (i, 0)),
        ),
        compiler_params=pltpu.CompilerParams(
            dimension_semantics=("parallel",),                  # megacore-shard batch tiles
        ),
    )(xm, w1.astype(jnp.bfloat16), b1.reshape(1, H).astype(jnp.float32), w2p, b2p, G)

    return a_flat[:, :VV].reshape(task_num, N, V, V)


def graph_generator_reference(x, w1, b1, w2, b2):
    """Pure-JAX f32 reference mirroring the PyTorch forward exactly."""
    task_num, N, C, T, V, M = x.shape
    xm = jnp.mean(x.astype(jnp.float32), axis=(3, 5))           # (task, N, C, V)
    x_flat = xm.reshape(task_num * N, C * V)
    h = jnp.maximum(x_flat @ w1 + b1, 0.0)
    logits = (h @ w2 + b2).reshape(task_num, N, V, V)
    return jax.nn.softmax(logits, axis=-1)


if __name__ == "__main__":
    # Small shapes consistent with the module (num_joints=V, in_channels=C).
    task_num, N, C, T, V, M = 2, 3, 4, 16, 8, 2
    hidden = 128  # fixed by GraphGenerator.__init__

    key = jax.random.PRNGKey(0)
    kx, k1, k2, k3, k4 = jax.random.split(key, 5)

    x = jax.random.normal(kx, (task_num, N, C, T, V, M), dtype=jnp.float32)

    # Deterministic parameter init (PyTorch-Linear-style uniform bounds).
    in1, out1 = C * V, hidden
    in2, out2 = hidden, V * V
    bound1 = 1.0 / jnp.sqrt(in1)
    bound2 = 1.0 / jnp.sqrt(in2)
    w1 = jax.random.uniform(k1, (in1, out1), jnp.float32, -bound1, bound1)
    b1 = jax.random.uniform(k2, (out1,), jnp.float32, -bound1, bound1)
    w2 = jax.random.uniform(k3, (in2, out2), jnp.float32, -bound2, bound2)
    b2 = jax.random.uniform(k4, (out2,), jnp.float32, -bound2, bound2)

    forward = jax.jit(graph_generator_forward)
    A = jax.block_until_ready(forward(x, w1, b1, w2, b2))

    A_ref = graph_generator_reference(x, w1, b1, w2, b2)
    assert A.shape == (task_num, N, V, V)
    # bf16 streaming of activations/weights (with f32 accumulation) keeps the
    # error at the few-1e-4 level for these magnitudes.
    assert jnp.allclose(A, A_ref, atol=5e-3, rtol=5e-3), "mismatch vs reference"
    # Exact divide in the kernel -> every adjacency row is stochastic.
    assert jnp.allclose(jnp.sum(A, axis=-1), 1.0, atol=1e-3), "rows not stochastic"

    print("KERNEL_OK")
</pallas_src>

<mosaic_0001>
module attributes {stable_mosaic.version = 11 : i64} {
  func.func @graph_generator_kernel(%arg0: i32, %arg1: memref<16x32xbf16, #tpu.memory_space<vmem>>, %arg2: memref<32x128xbf16, #tpu.memory_space<vmem>>, %arg3: memref<1x128xf32, #tpu.memory_space<vmem>>, %arg4: memref<128x128xbf16, #tpu.memory_space<vmem>>, %arg5: memref<1x128xf32, #tpu.memory_space<vmem>>, %arg6: memref<128x128xf32, #tpu.memory_space<vmem>>, %arg7: memref<16x128xf32, #tpu.memory_space<vmem>>) attributes {dimension_semantics = [#tpu.dimension_semantics<parallel>], iteration_bounds = array<i64: 1>, scalar_prefetch = 0 : i64, scratch_operands = 0 : i64, tpu.core_type = #tpu.core_type<tc>, window_params = [{transform_indices = @transform_0, window_bounds = array<i64: 16, 32>}, {pipeline_mode = #tpu.pipeline_mode<synchronous>, transform_indices = @transform_1, window_bounds = array<i64: 32, 128>}, {pipeline_mode = #tpu.pipeline_mode<synchronous>, transform_indices = @transform_2, window_bounds = array<i64: 1, 128>}, {pipeline_mode = #tpu.pipeline_mode<synchronous>, transform_indices = @transform_3, window_bounds = array<i64: 128, 128>}, {pipeline_mode = #tpu.pipeline_mode<synchronous>, transform_indices = @transform_4, window_bounds = array<i64: 1, 128>}, {pipeline_mode = #tpu.pipeline_mode<synchronous>, transform_indices = @transform_5, window_bounds = array<i64: 128, 128>}, {transform_indices = @transform_6, window_bounds = array<i64: 16, 128>}]} {
    %c0 = arith.constant 0 : index
    %c0_0 = arith.constant 0 : index
    %0 = vector.load %arg1[%c0, %c0_0] : memref<16x32xbf16, #tpu.memory_space<vmem>>, vector<16x32xbf16>
    %c0_1 = arith.constant 0 : index
    %c0_2 = arith.constant 0 : index
    %1 = vector.load %arg2[%c0_1, %c0_2] : memref<32x128xbf16, #tpu.memory_space<vmem>>, vector<32x128xbf16>
    %cst = arith.constant dense<0.000000e+00> : vector<16x128xf32>
    %2 = tpu.matmul %0, %1, %cst {dimension_numbers = #tpu.dot_dimension_numbers<[1], [0], [0], [1], [0, 0, 1, 1], [], []>} : vector<16x32xbf16>, vector<32x128xbf16>, vector<16x128xf32> -> vector<16x128xf32>
    %c0_3 = arith.constant 0 : index
    %c0_4 = arith.constant 0 : index
    %3 = vector.load %arg3[%c0_3, %c0_4] : memref<1x128xf32, #tpu.memory_space<vmem>>, vector<1x128xf32>
    %4 = vector.broadcast %3 : vector<1x128xf32> to vector<16x128xf32>
    %5 = arith.addf %2, %4 : vector<16x128xf32>
    %cst_5 = arith.constant 0.000000e+00 : f32
    %6 = vector.broadcast %cst_5 : f32 to vector<16x128xf32>
    %7 = arith.maximumf %5, %6 : vector<16x128xf32>
    %8 = arith.truncf %7 : vector<16x128xf32> to vector<16x128xbf16>
    %c0_6 = arith.constant 0 : index
    %c0_7 = arith.constant 0 : index
    %9 = vector.load %arg4[%c0_6, %c0_7] : memref<128x128xbf16, #tpu.memory_space<vmem>>, vector<128x128xbf16>
    %cst_8 = arith.constant dense<0.000000e+00> : vector<16x128xf32>
    %10 = tpu.matmul %8, %9, %cst_8 {dimension_numbers = #tpu.dot_dimension_numbers<[1], [0], [0], [1], [0, 0, 1, 1], [], []>} : vector<16x128xbf16>, vector<128x128xbf16>, vector<16x128xf32> -> vector<16x128xf32>
    %c0_9 = arith.constant 0 : index
    %c0_10 = arith.constant 0 : index
    %11 = vector.load %arg5[%c0_9, %c0_10] : memref<1x128xf32, #tpu.memory_space<vmem>>, vector<1x128xf32>
    %12 = vector.broadcast %11 : vector<1x128xf32> to vector<16x128xf32>
    %13 = arith.addf %10, %12 : vector<16x128xf32>
    %cst_11 = arith.constant dense<0xFF800000> : vector<16xf32>
    %14 = vector.multi_reduction <maximumf>, %13, %cst_11 [1] : vector<16x128xf32> to vector<16xf32>
    %15 = vector.shape_cast %14 : vector<16xf32> to vector<16x1xf32>
    %16 = vector.broadcast %15 : vector<16x1xf32> to vector<16x128xf32>
    %17 = arith.subf %13, %16 : vector<16x128xf32>
    %18 = math.exp %17 : vector<16x128xf32>
    %c0_12 = arith.constant 0 : index
    %c0_13 = arith.constant 0 : index
    %19 = vector.load %arg6[%c0_12, %c0_13] : memref<128x128xf32, #tpu.memory_space<vmem>>, vector<128x128xf32>
    %cst_14 = arith.constant dense<0.000000e+00> : vector<16x128xf32>
    %20 = tpu.matmul %18, %19, %cst_14 {dimension_numbers = #tpu.dot_dimension_numbers<[1], [0], [0], [1], [0, 0, 1, 1], [], []>} : vector<16x128xf32>, vector<128x128xf32>, vector<16x128xf32> -> vector<16x128xf32>
    %cst_15 = arith.constant 1.17549435E-38 : f32
    %21 = vector.broadcast %cst_15 : f32 to vector<16x128xf32>
    %22 = arith.maximumf %20, %21 : vector<16x128xf32>
    %23 = arith.divf %18, %22 : vector<16x128xf32>
    %c0_16 = arith.constant 0 : index
    %c0_17 = arith.constant 0 : index
    %24 = vector.load %arg7[%c0_16, %c0_17] : memref<16x128xf32, #tpu.memory_space<vmem>>, vector<16x128xf32>
    tpu.vector_store %arg7[%c0_16, %c0_17], %23 {strides = array<i32>} : memref<16x128xf32, #tpu.memory_space<vmem>>, vector<16x128xf32>,
    return
  }
  func.func @transform_0(%arg0: i32) -> (i32, i32) {
    %c0_i32 = arith.constant 0 : i32
    %c0_i32_0 = arith.constant 0 : i32
    return %arg0, %c0_i32 : i32, i32
  }
  func.func @transform_1(%arg0: i32) -> (i32, i32) {
    %c0_i32 = arith.constant 0 : i32
    %c0_i32_0 = arith.constant 0 : i32
    %c0_i32_1 = arith.constant 0 : i32
    return %c0_i32, %c0_i32_0 : i32, i32
  }
  func.func @transform_2(%arg0: i32) -> (i32, i32) {
    %c0_i32 = arith.constant 0 : i32
    %c0_i32_0 = arith.constant 0 : i32
    %c0_i32_1 = arith.constant 0 : i32
    return %c0_i32, %c0_i32_0 : i32, i32
  }
  func.func @transform_3(%arg0: i32) -> (i32, i32) {
    %c0_i32 = arith.constant 0 : i32
    %c0_i32_0 = arith.constant 0 : i32
    %c0_i32_1 = arith.constant 0 : i32
    return %c0_i32, %c0_i32_0 : i32, i32
  }
  func.func @transform_4(%arg0: i32) -> (i32, i32) {
    %c0_i32 = arith.constant 0 : i32
    %c0_i32_0 = arith.constant 0 : i32
    %c0_i32_1 = arith.constant 0 : i32
    return %c0_i32, %c0_i32_0 : i32, i32
  }
  func.func @transform_5(%arg0: i32) -> (i32, i32) {
    %c0_i32 = arith.constant 0 : i32
    %c0_i32_0 = arith.constant 0 : i32
    %c0_i32_1 = arith.constant 0 : i32
    return %c0_i32, %c0_i32_0 : i32, i32
  }
  func.func @transform_6(%arg0: i32) -> (i32, i32) {
    %c0_i32 = arith.constant 0 : i32
    %c0_i32_0 = arith.constant 0 : i32
    return %arg0, %c0_i32 : i32, i32
  }
}

</mosaic_0001>

<bundles_post_ra>
// kernel: graph_generator_forward.1
= control target key start
LH: loop header
LB: loop body
LE: loop exit
PB: predicated region body
PF: predicated region fallthrough
CT: control target
= control target key end

     0   :  { %v490_v1 = vmov 0.0   ;;  %vm491_vm0 = vmmov 0   ;;  %vm54_vm1 = vcmask 261120   ;;  %s617_s0 = inlined_call_operand.vmem [shape: bf16[6,32], index: 0, kind: input, shape index: {}]   ;;  %s618_s1 = inlined_call_operand.vmem [shape: bf16[32,128], index: 1, kind: input, shape index: {}]   ;;  %s619_s2 = inlined_call_operand.vmem [shape: f32[1,128], index: 2, kind: input, shape index: {}]   ;;  %s620_s3 = inlined_call_operand.vmem [shape: bf16[128,128], index: 3, kind: input, shape index: {}]   ;;  %s621_s4 = inlined_call_operand.vmem [shape: f32[1,128], index: 4, kind: input, shape index: {}]   ;;  %s622_s5 = inlined_call_operand.vmem [shape: f32[128,128], index: 5, kind: input, shape index: {}]   ;;  %s623_s6 = inlined_call_operand.vmem [shape: f32[6,128], index: 6, kind: output, shape index: {}]  }
   0x1   :  { %v473_v0 = vld [vmem:[%s618_s1 + $0x8] sm:$0xff]   ;;  %408 = vmatprep.subr.bf16.mxu0 %v490_v1  ;;  %416 = vmatprep.subr.bf16.mxu1 %v490_v1  ;;  %v474_v2 = vld [vmem:[%s618_s1] sm:$0xff]   ;;  %v476_v3 = vld [vmem:[%s620_s3 + $0x38] sm:$0xff]  }
   0x2   :  { %409 = vmatpush3.bf16.msra.mxu0 %v473_v0  ;;  %412 = vmatprep.mubr.msk.bf16.mxu0 %vm491_vm0, %v490_v1  ;;  %v475_v4 = vld [vmem:[%s617_s0] sm:$0xff]   ;;  %v477_v5 = vld [vmem:[%s620_s3 + $0x30] sm:$0xff]   ;;  %v478_v6 = vld [vmem:[%s620_s3 + $0x28] sm:$0xff]  }
   0x3   :  { %410 = vmatprep.subr.bf16.mxu0 %v490_v1  ;;  %432 = vmatprep.mubr.msk.bf16.mxu1 %vm491_vm0, %v490_v1  ;;  %v479_v7 = vld [vmem:[%s620_s3 + $0x20] sm:$0xff]   ;;  %v480_v8 = vld [vmem:[%s620_s3 + $0x18] sm:$0xff]   ;;  %v481_v9 = vld [vmem:[%s620_s3 + $0x10] sm:$0xff]  }
   0x4   :  { %417 = vmatpush3.bf16.msra.mxu1 %v476_v3  ;;  %v482_v10 = vld [vmem:[%s620_s3 + $0x8] sm:$0xff]   ;;  %v483_v11 = vld [vmem:[%s620_s3] sm:$0xff]   ;;  %v239_v22 = vld [vmem:[%s622_s5 + $0x78] sm:$0xff] }
   0x5   :  { %418 = vmatprep.subr.bf16.mxu1 %v490_v1  ;;  %v364_v12 = vld [vmem:[%s619_s2] ss:$0 sm:$0xff]  ;;  %v238_v23 = vld [vmem:[%s622_s5 + $0x70] sm:$0xff]  ;;  %v237_v24 = vld [vmem:[%s622_s5 + $0x68] sm:$0xff] }
   0x6   :  { %411 = vmatpush3.bf16.msra.mxu0 %v474_v2  ;;  %v236_v25 = vld [vmem:[%s622_s5 + $0x60] sm:$0xff]  ;;  %v235_v26 = vld [vmem:[%s622_s5 + $0x58] sm:$0xff]  ;;  %v234_v34 = vld [vmem:[%s622_s5 + $0x50] sm:$0xff] }
   0x7   :  { %436 = vmatprep.subr.mxu0 %v239_v22  ;;  %v369_v27 = vld [vmem:[%s621_s4] ss:$0 sm:$0xff]  ;;  %v233_v35 = vld [vmem:[%s622_s5 + $0x48] sm:$0xff]  ;;  %v231_v37 = vld [vmem:[%s622_s5 + $0x38] sm:$0xff] }
   0x8   :  { %419 = vmatpush3.bf16.msra.mxu1 %v477_v5  ;;  %v232_v36 = vld [vmem:[%s622_s5 + $0x40] sm:$0xff]  ;;  %v230_v38 = vld [vmem:[%s622_s5 + $0x30] sm:$0xff]  ;;  %v229_v39 = vld [vmem:[%s622_s5 + $0x28] sm:$0xff] }
   0x9   :  { %413 = vmatmul.mubr.msk.bf16.vlgmr.msra.gmra.mxu0 %vm54_vm1, %v475_v4  ;;  %420 = vmatprep.subr.bf16.mxu1 %v490_v1  ;;  %v228_v40 = vld [vmem:[%s622_s5 + $0x20] sm:$0xff]  ;;  %v227_v41 = vld [vmem:[%s622_s5 + $0x18] sm:$0xff]  ;;  %v226_v42 = vld [vmem:[%s622_s5 + $0x10] sm:$0xff] }
   0xa   :  { %437 = vmatpush3.msra.mxu0 %v239_v22  ;;  %v225_v43 = vld [vmem:[%s622_s5 + $0x8] sm:$0xff]  ;;  %v224_v44 = vld [vmem:[%s622_s5] sm:$0xff] }
   0xb   :  { %438 = vmatprep.subr.mxu0 %v238_v23 }
   0xc   :  { %421 = vmatpush3.bf16.msra.mxu1 %v478_v6  ;;  %439 = vmatpush3.msra.mxu0 %v238_v23 }
   0xd   :  { %422 = vmatprep.subr.bf16.mxu1 %v490_v1  ;;  %440 = vmatprep.subr.mxu0 %v237_v24 }
   0xe   :  { %441 = vmatpush3.msra.mxu0 %v237_v24 }
   0xf   :  { %442 = vmatprep.subr.mxu0 %v236_v25 }
  0x10   :  { %423 = vmatpush3.bf16.msra.mxu1 %v479_v7  ;;  %443 = vmatpush3.msra.mxu0 %v236_v25 }
  0x11   :  { %424 = vmatprep.subr.bf16.mxu1 %v490_v1  ;;  %444 = vmatprep.subr.mxu0 %v235_v26 }
  0x12   :  { %445 = vmatpush3.msra.mxu0 %v235_v26 }
  0x13   :  { %446 = vmatprep.subr.mxu0 %v234_v34 }
  0x14   :  { %425 = vmatpush3.bf16.msra.mxu1 %v480_v8  ;;  %447 = vmatpush3.msra.mxu0 %v234_v34 }
  0x15   :  { %426 = vmatprep.subr.bf16.mxu1 %v490_v1  ;;  %448 = vmatprep.subr.mxu0 %v233_v35 }
  0x16   :  { %449 = vmatpush3.msra.mxu0 %v233_v35 }
  0x17   :  { %450 = vmatprep.subr.mxu0 %v232_v36 }
  0x18   :  { %427 = vmatpush3.bf16.msra.mxu1 %v481_v9  ;;  %451 = vmatpush3.msra.mxu0 %v232_v36 }
  0x19   :  { %428 = vmatprep.subr.bf16.mxu1 %v490_v1  ;;  %452 = vmatprep.subr.mxu0 %v231_v37 }
  0x1a   :  { %453 = vmatpush3.msra.mxu0 %v231_v37 }
  0x1b   :  { %454 = vmatprep.subr.mxu0 %v230_v38 }
  0x1c   :  { %429 = vmatpush3.bf16.msra.mxu1 %v482_v10  ;;  %455 = vmatpush3.msra.mxu0 %v230_v38 }
  0x1d   :  { %430 = vmatprep.subr.bf16.mxu1 %v490_v1  ;;  %456 = vmatprep.subr.mxu0 %v229_v39 }
  0x1e   :  { %457 = vmatpush3.msra.mxu0 %v229_v39 }
  0x1f   :  { %458 = vmatprep.subr.mxu0 %v228_v40 }
  0x20   :  { %431 = vmatpush3.bf16.msra.mxu1 %v483_v11  ;;  %459 = vmatpush3.msra.mxu0 %v228_v40 }
  0x21   :  { %460 = vmatprep.subr.mxu0 %v227_v41 }
  0x22   :  { %461 = vmatpush3.msra.mxu0 %v227_v41 }
  0x23   :  { %462 = vmatprep.subr.mxu0 %v226_v42 }
  0x24   :  { %463 = vmatpush3.msra.mxu0 %v226_v42 }
  0x25   :  { %464 = vmatprep.subr.mxu0 %v225_v43 }
  0x26   :  { %465 = vmatpush3.msra.mxu0 %v225_v43 }
  0x27   :  { %466 = vmatprep.subr.mxu0 %v224_v44 }
  0x28   :  { %467 = vmatpush3.msra.mxu0 %v224_v44 }
  0xc9   :  { %v92_v13 = vpop.f32.mrf.mxu0 }
  0xca   :  { %v93_v15 = vadd.f32 %v364_v12, %v92_v13 }
  0xcb   :  { %v414_v14 = vpop.f32.mrf.mxu0 }
  0xcc   :  { %v99_v19 = vmax.f32 %v93_v15, 0.0 }
  0xcd   :  { %v95_v16 = vpop.f32.mrf.mxu0 }
  0xce   :  { %v96_v17 = vadd.f32 %v364_v12, %v95_v16 }
  0xcf   :  { %v415_v18 = vpop.f32.mrf.mxu0 }
  0xd0   :  { %v100_v20 = vmax.f32 %v96_v17, 0.0 }
  0xd2   :  { %v101_v21 = vpack.c.bf16 %v100_v20, %v99_v19 }
  0xd4   :  { %433 = vmatmul.mubr.bf16.vlgmr.msra.gmra.mxu1 %v101_v21 }
 0x194   :  { %v207_v28 = vpop.f32.mrf.mxu1 }
 0x195   :  { %v208_v29 = vadd.f32 %v369_v27, %v207_v28 }
 0x196   :  { %v434_v30 = vpop.f32.mrf.mxu1 }
 0x197   :  { %214 = vmax.xlane.f32.xlu0 %v208_v29 }
 0x198   :  { %v210_v31 = vpop.f32.mrf.mxu1 }
 0x199   :  { %v211_v32 = vadd.f32 %v369_v27, %v210_v31 }
 0x19a   :  { %v435_v33 = vpop.f32.mrf.mxu1 }
 0x19b   :  { %216 = vmax.xlane.f32.xlu0 %v211_v32 }
 0x220   :  { %v215_v45 = vpop.xlane.xlu0 %214 }
 0x221   :  { %v218_v46 = vsub.f32 %v208_v29, %v215_v45 }
 0x223   :  { %v220_v47 = vmul.f32 1.442695, %v218_v46 }
 0x224   :  { %v217_v48 = vpop.xlane.xlu0 %216 }
 0x225   :  { %484 = vpow2.f32 %v220_v47  ;;  %v219_v49 = vsub.f32 %v211_v32, %v217_v48 }
 0x227   :  { %v222_v50 = vmul.f32 1.442695, %v219_v49 }
 0x229   :  { %486 = vpow2.f32 %v222_v50 }
 0x232   :  { %v485_v51 = vpop.eup %484 }
 0x233   :  { %468 = vmatprep.mubr.f32.mxu0 %v485_v51 }
 0x236   :  { %v487_v52 = vpop.eup %486 }
 0x237   :  { %469 = vmatmul.mubr.f32.vlgmr.msra.gmra.mxu0 %v487_v52 }
 0x2f7   :  { %v470_v53 = vpop.f32.mrf.mxu0 }
 0x2f9   :  { %v306_v54 = vpop.f32.mrf.mxu0 }
 0x2fa   :  { %v315_v55 = vmax.f32 %v306_v54, 1.1754944e-38 }
 0x2fc   :  { %488 = vrcp.f32 %v315_v55 }
 0x309   :  { %v489_v56 = vpop.eup %488 }
 0x30a   :  { %v318_v57 = vmul.f32 %v489_v56, %v485_v51 }
 0x30c   :  { %354 = vst [vmem:[%s623_s6] sm:$0xff] %v318_v57 }

</bundles_post_ra>
